<compile_context>
chip_gen: v7x
topology: tpu7x:2x2x1
jax: 0.10.0
libtpu: 0.0.40
codegen_flags: <defaults>
</compile_context>

<pallas_src>
import math

import jax
import jax.numpy as jnp
from jax.experimental import pallas as pl
from jax.experimental.pallas import tpu as pltpu

NEG_SLOPE = 0.01  # F.leaky_relu default


def _mpnn_attn_kernel(h_ref, s3_ref, waug_ref, out_ref):
    """One grid step = `Bt` whole graphs.

    h_ref:    (Bt, N, D)           node features
    s3_ref:   (Bt, N, N)           pre-contracted edge term <e_ij, w3>
    waug_ref: (D, out_dim + 2)     [W_fc^T | W_fc^T w1 | W_fc^T w2]
    out_ref:  (Bt, N, out_dim)
    """
    Bt, N, D = h_ref.shape
    out_dim = out_ref.shape[-1]

    # One MXU matmul produces z, <z, w1> and <z, w2> for every node in the block.
    h2 = h_ref[...].reshape(Bt * N, D)
    z_aug = jnp.dot(h2, waug_ref[...], preferred_element_type=jnp.float32)

    # Static unroll over graphs folded into this block (pure 2-D vector math).
    for g in range(Bt):
        r0 = g * N
        z = z_aug[r0:r0 + N, :out_dim]                   # (N, out_dim)
        sj = z_aug[r0:r0 + N, out_dim:out_dim + 1]       # (N, 1)  <z_j, w1>
        si = z_aug[r0:r0 + N, out_dim + 1:out_dim + 2]   # (N, 1)  <z_i, w2>

        # eij[i, j] = <z_i, w2> + <z_j, w1> + <e_ij, w3>, then leaky_relu.
        eij = si + jnp.transpose(sj) + s3_ref[g]          # (N, N)
        eij = jnp.where(eij > 0, eij, NEG_SLOPE * eij)

        # torch: softmax over dim=1 of (B, N*N, 1) -> global softmax over all
        # (i, j) pairs of the graph.  Only row reductions touch the full tile;
        # the scalars are reduced from the (N, 1) partials.
        rowmax = jnp.max(eij, axis=1, keepdims=True)      # (N, 1)
        gmax = jnp.max(rowmax, axis=0, keepdims=True)     # (1, 1)  global max
        p = jnp.exp(eij - gmax)                           # (N, N)
        rownum = jnp.sum(p, axis=1, keepdims=True)        # (N, 1)
        total = jnp.sum(rownum, axis=0, keepdims=True)    # (1, 1)

        # EUP reciprocal + one Newton step (exact to f32 for our tolerance).
        inv = pl.reciprocal(total, approx=True)
        inv = inv * (2.0 - total * inv)

        # h_t[i, :] = sum_j alpha[i, j] * z[i, :] = z[i, :] * (rownum[i] / total)
        out_ref[g] = (z * (rownum * inv)).astype(out_ref.dtype)


def mpnn_single_h_attn_method3(h0, e, w_fc, w_attn, *, block_b=1):
    """h0: (B, N, D), e: (B, N, N, E), w_fc: (out_dim, D), w_attn: (1, 2*out_dim+E)."""
    B, N, D = h0.shape
    E = e.shape[-1]
    out_dim = w_fc.shape[0]
    if B % block_b != 0:
        block_b = 1

    f32 = jnp.float32
    wfc_t = jnp.asarray(w_fc, f32).T                           # (D, out_dim)
    w1 = jnp.asarray(w_attn[0, :out_dim], f32)                 # multiplies z_j
    w2 = jnp.asarray(w_attn[0, out_dim:2 * out_dim], f32)      # multiplies z_i
    w3 = jnp.asarray(w_attn[0, 2 * out_dim:], f32)             # multiplies e_ij

    # Fuse the two attention mat-vecs into the fc matmul (single MXU pass).
    w_aug = jnp.concatenate(
        [wfc_t, (wfc_t @ w1)[:, None], (wfc_t @ w2)[:, None]], axis=1)  # (D, out_dim+2)

    # Hoist the dominant edge contraction: the kernel's HBM stream for the
    # pairwise tensor shrinks by a factor of E and loses its padded trailing dim.
    s3 = jnp.einsum('bije,e->bij', e.astype(f32), w3)           # (B, N, N)

    # NOTE: for very large N the (N, N) pairwise block should itself be tiled
    # over row-tiles with a two-pass / online global softmax (needed to fit
    # v7x's 64 MiB VMEM); not required at these sizes.
    return pl.pallas_call(
        _mpnn_attn_kernel,
        out_shape=jax.ShapeDtypeStruct((B, N, out_dim), f32),
        grid=(B // block_b,),
        in_specs=[
            pl.BlockSpec((block_b, N, D), lambda b: (b, 0, 0)),
            pl.BlockSpec((block_b, N, N), lambda b: (b, 0, 0)),
            pl.BlockSpec((D, out_dim + 2), lambda b: (0, 0)),
        ],
        out_specs=pl.BlockSpec((block_b, N, out_dim), lambda b: (b, 0, 0)),
        compiler_params=pltpu.CompilerParams(dimension_semantics=("parallel",)),
    )(h0.astype(f32), s3, w_aug)


def ref_method3(h0, e, w_fc, w_attn):
    """Pure-JAX transliteration of MPNNSingleHAttn.method3 (for verification)."""
    B, N, D = h0.shape
    z = jnp.einsum('bnd,od->bno', h0, w_fc)                  # fc, no bias
    out_dim = z.shape[-1]
    z1 = jnp.tile(z, (1, N, 1))                              # torch .repeat(1, N, 1)
    z2 = jnp.repeat(z, N, axis=1)                            # torch .repeat_interleave(N, dim=1)
    m = e.reshape(B, N * N, -1)
    zij = jnp.concatenate([z1, z2, m], axis=2)               # (B, N*N, 2*out_dim+E)
    eij = jax.nn.leaky_relu(zij @ w_attn.T, NEG_SLOPE)       # (B, N*N, 1)
    alpha = jax.nn.softmax(eij, axis=1)                      # softmax over all pairs
    alpha = alpha.reshape(B, N, N, 1)
    z_exp = jnp.broadcast_to(z[:, :, None, :], (B, N, N, out_dim))
    return jnp.sum(alpha * z_exp, axis=2)


if __name__ == "__main__":
    B, N, D, out_dim, E = 2, 8, 32, 16, 8   # in_n = [D, E], hidden_state_size = D

    key = jax.random.PRNGKey(0)
    k1, k2, k3, k4 = jax.random.split(key, 4)

    gain = math.sqrt(2.0)  # nn.init.calculate_gain('relu')
    std_fc = gain * math.sqrt(2.0 / (D + out_dim))
    std_attn = gain * math.sqrt(2.0 / (2 * out_dim + E + 1))
    w_fc = std_fc * jax.random.normal(k1, (out_dim, D), jnp.float32)
    w_attn = std_attn * jax.random.normal(k2, (1, 2 * out_dim + E), jnp.float32)

    h0 = jax.random.normal(k3, (B, N, D), jnp.float32)
    e = jax.random.normal(k4, (B, N, N, E), jnp.float32)

    ref = ref_method3(h0, e, w_fc, w_attn)

    # One graph per grid step: batch axis stays a "parallel" grid dim (v7x megacore).
    out1 = jax.block_until_ready(
        mpnn_single_h_attn_method3(h0, e, w_fc, w_attn, block_b=1))
    # All graphs folded into one grid step: amortizes per-step overhead on
    # single-TensorCore parts (v5e/v6e).
    out2 = jax.block_until_ready(
        mpnn_single_h_attn_method3(h0, e, w_fc, w_attn, block_b=2))

    assert out1.shape == (B, N, out_dim)
    assert jnp.allclose(out1, ref, atol=2e-3, rtol=2e-3), (out1, ref)
    assert jnp.allclose(out2, ref, atol=2e-3, rtol=2e-3), (out2, ref)

    print("KERNEL_OK")
</pallas_src>

<mosaic_0001>
module attributes {stable_mosaic.version = 11 : i64} {
  func.func @_mpnn_attn_kernel(%arg0: i32, %arg1: memref<1x8x32xf32, #tpu.memory_space<vmem>>, %arg2: memref<1x8x8xf32, #tpu.memory_space<vmem>>, %arg3: memref<32x18xf32, #tpu.memory_space<vmem>>, %arg4: memref<1x8x16xf32, #tpu.memory_space<vmem>>) attributes {dimension_semantics = [#tpu.dimension_semantics<parallel>], iteration_bounds = array<i64: 2>, scalar_prefetch = 0 : i64, scratch_operands = 0 : i64, tpu.core_type = #tpu.core_type<tc>, window_params = [{transform_indices = @transform_0, window_bounds = array<i64: 1, 8, 32>}, {transform_indices = @transform_1, window_bounds = array<i64: 1, 8, 8>}, {pipeline_mode = #tpu.pipeline_mode<synchronous>, transform_indices = @transform_2, window_bounds = array<i64: 32, 18>}, {transform_indices = @transform_3, window_bounds = array<i64: 1, 8, 16>}]} {
    %c0 = arith.constant 0 : index
    %c0_0 = arith.constant 0 : index
    %c0_1 = arith.constant 0 : index
    %0 = vector.load %arg1[%c0, %c0_0, %c0_1] : memref<1x8x32xf32, #tpu.memory_space<vmem>>, vector<1x8x32xf32>
    %1 = vector.shape_cast %0 : vector<1x8x32xf32> to vector<8x32xf32>
    %c0_2 = arith.constant 0 : index
    %c0_3 = arith.constant 0 : index
    %2 = vector.load %arg3[%c0_2, %c0_3] : memref<32x18xf32, #tpu.memory_space<vmem>>, vector<32x18xf32>
    %cst = arith.constant dense<0.000000e+00> : vector<8x18xf32>
    %3 = tpu.matmul %1, %2, %cst {dimension_numbers = #tpu.dot_dimension_numbers<[1], [0], [0], [1], [0, 0, 1, 1], [], []>} : vector<8x32xf32>, vector<32x18xf32>, vector<8x18xf32> -> vector<8x18xf32>
    %4 = vector.extract_strided_slice %3 {offsets = [0, 0], sizes = [8, 16], strides = [1, 1]} : vector<8x18xf32> to vector<8x16xf32>
    %5 = vector.extract_strided_slice %3 {offsets = [0, 16], sizes = [8, 1], strides = [1, 1]} : vector<8x18xf32> to vector<8x1xf32>
    %6 = vector.extract_strided_slice %3 {offsets = [0, 17], sizes = [8, 1], strides = [1, 1]} : vector<8x18xf32> to vector<8x1xf32>
    %7 = tpu.transpose %5, [1, 0] : vector<8x1xf32> -> vector<1x8xf32>
    %8 = vector.broadcast %6 : vector<8x1xf32> to vector<8x8xf32>
    %9 = vector.broadcast %7 : vector<1x8xf32> to vector<8x8xf32>
    %10 = arith.addf %8, %9 : vector<8x8xf32>
    %c0_4 = arith.constant 0 : index
    %c0_5 = arith.constant 0 : index
    %c0_6 = arith.constant 0 : index
    %11 = vector.load %arg2[%c0_4, %c0_5, %c0_6] : memref<1x8x8xf32, #tpu.memory_space<vmem>>, vector<1x8x8xf32>
    %12 = vector.shape_cast %11 : vector<1x8x8xf32> to vector<8x8xf32>
    %13 = arith.addf %10, %12 : vector<8x8xf32>
    %cst_7 = arith.constant 0.000000e+00 : f32
    %14 = vector.broadcast %cst_7 : f32 to vector<8x8xf32>
    %15 = arith.cmpf ogt, %13, %14 : vector<8x8xf32>
    %cst_8 = arith.constant 0.00999999977 : f32
    %16 = vector.broadcast %cst_8 : f32 to vector<8x8xf32>
    %17 = arith.mulf %16, %13 : vector<8x8xf32>
    %18 = arith.select %15, %13, %17 : vector<8x8xi1>, vector<8x8xf32>
    %cst_9 = arith.constant dense<0xFF800000> : vector<8xf32>
    %19 = vector.multi_reduction <maximumf>, %18, %cst_9 [1] : vector<8x8xf32> to vector<8xf32>
    %20 = vector.shape_cast %19 : vector<8xf32> to vector<8x1xf32>
    %cst_10 = arith.constant dense<0xFF800000> : vector<1xf32>
    %21 = vector.multi_reduction <maximumf>, %20, %cst_10 [0] : vector<8x1xf32> to vector<1xf32>
    %22 = vector.shape_cast %21 : vector<1xf32> to vector<1x1xf32>
    %23 = vector.broadcast %22 : vector<1x1xf32> to vector<8x8xf32>
    %24 = arith.subf %18, %23 : vector<8x8xf32>
    %25 = math.exp %24 : vector<8x8xf32>
    %cst_11 = arith.constant dense<0.000000e+00> : vector<8xf32>
    %26 = vector.multi_reduction <add>, %25, %cst_11 [1] : vector<8x8xf32> to vector<8xf32>
    %27 = vector.shape_cast %26 : vector<8xf32> to vector<8x1xf32>
    %cst_12 = arith.constant dense<0.000000e+00> : vector<1xf32>
    %28 = vector.multi_reduction <add>, %27, %cst_12 [0] : vector<8x1xf32> to vector<1xf32>
    %29 = vector.shape_cast %28 : vector<1xf32> to vector<1x1xf32>
    %30 = tpu.reciprocal %29 {approx = true} : vector<1x1xf32> -> vector<1x1xf32>
    %31 = arith.mulf %29, %30 : vector<1x1xf32>
    %cst_13 = arith.constant 2.000000e+00 : f32
    %32 = vector.broadcast %cst_13 : f32 to vector<1x1xf32>
    %33 = arith.subf %32, %31 : vector<1x1xf32>
    %34 = arith.mulf %30, %33 : vector<1x1xf32>
    %35 = vector.broadcast %34 : vector<1x1xf32> to vector<8x1xf32>
    %36 = arith.mulf %27, %35 : vector<8x1xf32>
    %37 = vector.broadcast %36 : vector<8x1xf32> to vector<8x16xf32>
    %38 = arith.mulf %4, %37 : vector<8x16xf32>
    %c0_14 = arith.constant 0 : index
    %c0_15 = arith.constant 0 : index
    %c0_16 = arith.constant 0 : index
    %39 = vector.load %arg4[%c0_14, %c0_15, %c0_16] : memref<1x8x16xf32, #tpu.memory_space<vmem>>, vector<1x8x16xf32>
    %40 = vector.shape_cast %39 : vector<1x8x16xf32> to vector<8x16xf32>
    %41 = vector.shape_cast %38 : vector<8x16xf32> to vector<1x8x16xf32>
    tpu.vector_store %arg4[%c0_14, %c0_15, %c0_16], %41 {strides = array<i32>} : memref<1x8x16xf32, #tpu.memory_space<vmem>>, vector<1x8x16xf32>,
    return
  }
  func.func @transform_0(%arg0: i32) -> (i32, i32, i32) {
    %c0_i32 = arith.constant 0 : i32
    %c0_i32_0 = arith.constant 0 : i32
    %c0_i32_1 = arith.constant 0 : i32
    return %arg0, %c0_i32, %c0_i32_0 : i32, i32, i32
  }
  func.func @transform_1(%arg0: i32) -> (i32, i32, i32) {
    %c0_i32 = arith.constant 0 : i32
    %c0_i32_0 = arith.constant 0 : i32
    %c0_i32_1 = arith.constant 0 : i32
    return %arg0, %c0_i32, %c0_i32_0 : i32, i32, i32
  }
  func.func @transform_2(%arg0: i32) -> (i32, i32) {
    %c0_i32 = arith.constant 0 : i32
    %c0_i32_0 = arith.constant 0 : i32
    %c0_i32_1 = arith.constant 0 : i32
    return %c0_i32, %c0_i32_0 : i32, i32
  }
  func.func @transform_3(%arg0: i32) -> (i32, i32, i32) {
    %c0_i32 = arith.constant 0 : i32
    %c0_i32_0 = arith.constant 0 : i32
    %c0_i32_1 = arith.constant 0 : i32
    return %arg0, %c0_i32, %c0_i32_0 : i32, i32, i32
  }
}

</mosaic_0001>

<bundles_post_ra>
// kernel: tpu_custom_call.1
= control target key start
LH: loop header
LB: loop body
LE: loop exit
PB: predicated region body
PF: predicated region fallthrough
CT: control target
= control target key end

     0   :  { %8 = vsyncpa [#allocation3], 0  ;;  %s715_s0 = inlined_call_operand.vmem [shape: f32[2,8,32], index: 0, kind: input, shape index: {}]   ;;  %s716_s1 = inlined_call_operand.vmem [shape: f32[2,8,8], index: 1, kind: input, shape index: {}]   ;;  %s717_s2 = inlined_call_operand.vmem [shape: f32[32,18], index: 2, kind: input, shape index: {}]   ;;  %s718_s3 = inlined_call_operand.hbm [shape: f32[2,8,16], index: 3, kind: output, shape index: {}]  }
   0x1   :  { %10 = vsyncpa [#allocation3 + $0x1], 0  ;;  %s600_s12 = smov 0   ;;  %s602_s13 = smov 0  }
   0x2   :  { %s604_s14 = smov 0   ;;  %s606_s15 = smov 0  }
   0x3 LB: > { %s621_s16 = sadd.s32 4294967295, %s572_s15   ;;  %s427_s17 = sadd.s32 4294967294, %s572_s15   ;;  %s572_s15 = sphi %s606_s15, %s724_s15   ;;  %s568_s14 = sphi %s604_s14, %s723_s14   ;;  %s564_s13 = sphi %s602_s13, %s722_s13   ;;  %s560_s12 = sphi %s600_s12, %s721_s12  }
   0x4   : > { %s625_s18 = sadd.s32 1, %s572_s15   ;;  %s96_s19 = sadd.s32 1, %s568_s14 }
   0x5   : > { %s93_s20 = ssub.s32 %s572_s15, %s625_s18  ;;  %p106_p0 = scmp.ne.s32.totalorder %s568_s14, %s564_s13 }
   0x6   : > { %p94_p1 = scmp.eq.s32.totalorder %s93_s20, 0  ;;  %p107_p2 = scmp.eq.s32.totalorder %s621_s16, 1 }
   0x7   : > { %p112_p3 = scmp.ne.s32.totalorder %s564_s13, %s560_s12  ;;  %p113_p4 = scmp.eq.s32.totalorder %s427_s17, 1 }
   0x8   : > { %s636_s21 = scalar_select %p94_p1, %s568_s14, %s96_s19  }
   0x9   : > { %p638_p5 = por %p107_p2, %p106_p0  ;;  %p642_p6 = por %p113_p4, %p112_p3 }
   0xa   : > { %p430_p7 = scmp.ge.s32.totalorder %s572_s15, 1  ;;  %p148_p8 = scmp.lt.s32.totalorder %s572_s15, 3 }
   0xc   : > { %p149_p9 = pnand %p430_p7, %p148_p8 }
   0xd   : > { %v184_v0 = vld [vmem:[%s717_s2] sm:$0xff] (!%p149_p9)  ;;  %v185_v1 = vld [vmem:[%s717_s2 + $0x8] sm:$0xff] (!%p149_p9)  ;;  %v186_v2 = vld [vmem:[%s717_s2 + $0x10] sm:$0xff] (!%p149_p9)  ;;  %v574_v3 = vmov (!%p149_p9), 0.0|0.0   ;;  %vm575_vm0 = vmmov (!%p149_p9), 0   ;;  %v576_v6 = vmov (!%p149_p9), 0.0   ;;  %v302_v13 = vlaneseq (!%p149_p9) }
   0xe   : > { %152 = sbr.rel (%p149_p9) target bundleno = 851 (0x353), region = 32  ;;  %455 = vmatprep.subr.bf16.mxu0 (!%p149_p9), %v574_v3  ;;  %v456_v4 = vpack.c.bf16 (!%p149_p9), %v185_v1, %v184_v0  ;;  %v187_v5 = vld [vmem:[%s717_s2 + $0x18] sm:$0xff] (!%p149_p9)  ;;  %452 = vmatprep.mubr.msk.f32.mxu0 (!%p149_p9), %vm575_vm0, %v576_v6  ;;  %p175_p10 = scmp.lt.s32.totalorder (!%p149_p9), %s621_s16, 1  ;;  %vm188_vm1 = vcmask (!%p149_p9), 261120   ;;  %v577_v9 = vmov (!%p149_p9), 17   ;;  %vm312_vm3 = vcmask (!%p149_p9), 64512  }
   0xf   : > { %v459_v7 = vpack.c.bf16 (!%p149_p9), %v187_v5, %v186_v2  ;;  %505 = vset.pattern.permute.xlu0 (!%p149_p9), %v577_v9  ;;  %s578_s10 = smov (!%p149_p9), 112   ;;  %v303_v14 = vshrl.u32 (!%p149_p9), %v302_v13, 7  ;;  %s172_s20 = sand.u32 (!%p149_p9), 1, %s564_s13   ;;  %vm340_vm4 = vcmask (!%p149_p9), 130048  }
  0x10   : > { %457 = vmatpush3.bf16.msra.mxu0 (!%p149_p9), %v456_v4  ;;  %s431_s24 = sshll.u32 (!%p149_p9), %s172_s20, 3  ;;  %s436_s25 = sshll.u32 (!%p149_p9), %s621_s16, 7 }
  0x11   : > { %458 = vmatprep.subr.bf16.mxu0 (!%p149_p9), %v574_v3  ;;  %v304_v15 = vsub.s32 (!%p149_p9), 0, %v303_v14  ;;  %s174_s26 = scalar_lea.vmem (!%p149_p9), [#allocation2], %s431_s24  ;;  %s673_s30 = scalar_lea.hbm (!%p149_p9), %s718_s3, %s436_s25 }
  0x12   : > { %s356_s27 = sshll.u32 (!%p149_p9), %s174_s26, 4  ;;  %s343_s4 = scalar_lea.sflag (!%p149_p9), [#allocation3], %s172_s20  ;;  %s675_s27 = int_to_ptr.vmem [resolvable:$true] %s356_s27 }
  0x14   : > { %460 = vmatpush3.bf16.msra.mxu0 (!%p149_p9), %v459_v7 }
  0x15   : > { %s176_s5 = scalar_select %p175_p10, %s621_s16, 1 }
  0x16   : > { %s579_s16 = smov [#allocation2]  }
  0x17   : > { %s432_s6 = sshll.u32 %s176_s5, 3  ;;  %s510_s5 = scalar_lea.vmem %s675_s27, 128 }
  0x18   : > { %s178_s9 = scalar_lea.vmem %s715_s0, %s432_s6  ;;  %s182_s19 = scalar_lea.vmem %s716_s1, %s432_s6 }
  0x19   : > { %v183_v8 = vld [vmem:[%s178_s9] sm:$0xff]  ;;  %p511_p11 = scmp.ne.s32.totalorder %s675_s27, %s510_s5  ;;  %s514_s6 = sshll.u32 %s579_s16, 4  ;;  %s515_s6 = int_to_ptr.vmem [resolvable:$false] %s514_s6 }
  0x1a   : > { %453 = vmatmul.mubr.msk.f32.vlgmr.msra.gmra.mrb[0].mxu0 %vm188_vm1, %v183_v8  ;;  %v307_v19 = vld [vmem:[%s182_s19] sm:$0xff]  ;;  %s516_s7 = scalar_lea.vmem %s515_s6, 256  ;;  %p517_p0 = scmp.lt.s32.totalorder %s675_s27, %s515_s6 }
  0x1b   : > { %p512_p12 = pnand %p511_p11, %p638_p5  ;;  %p518_p1 = scmp.lt.s32.totalorder %s516_s7, %s510_s5 }
  0x1d   : > { %p513_p13 = pneg %p512_p12  ;;  %p519_p2 = por %p518_p1, %p517_p0 }
  0x1f   : > { %p520_p3 = pnand %p519_p2, %p513_p13 }
  0xed   : > { %v258_v10 = vpop.f32.mrb[0].mxu0 }
  0xee   : > { %263 = vrot.lane.b32.xlu0 %v258_v10, %s578_s10  ;;  %v454_v11 = vpop.f32.mrb[1].mxu0 }
  0xf2   : > { %299 = vperm.xlu0 %505, %v258_v10  }
 0x160   : > { %v264_v12 = vpop.permute.xlu0 %263 }
 0x161   : > { %266 = vxpose.xlu1.b32.start.end [1/1] (short) (narrow) %v264_v12, 8 }
 0x171   : > { %v300_v18 = vpop.permute.xlu0 %299 }
 0x1e1   : > { %v282_v16 = vpop.trf.xlu1 }
 0x1e2   : > { %v305_v17 = vrot.slane %v282_v16, %v304_v15 }
 0x1e4   : > { %v306_v20 = vadd.f32 %v305_v17, %v300_v18 }
 0x1e6   : > { %v308_v21 = vadd.f32 %v307_v19, %v306_v20 }
 0x1e8   : > { %vm309_vm2 = vcmp.gt.f32.partialorder %v308_v21, 0.0  ;;  %v310_v22 = vmul.f32 0.01, %v308_v21 }
 0x1ea   : > { %v311_v23 = vsel %vm309_vm2, %v308_v21, %v310_v22 }
 0x1eb   : > { %v313_v24 = vsel %vm312_vm3, %v311_v23, -inf }
 0x1ec   : > { %314 = vmax.xlane.f32.xlu1 %v313_v24 }
 0x279   : > { %v315_v25 = vpop.xlane.xlu1 %314 }
 0x27a   : > { %v316_v26 = vrot.slane %v315_v25, 4 }
 0x27c   : > { %v317_v27 = vmax.f32 %v315_v25, %v316_v26 }
 0x27e   : > { %v318_v28 = vrot.slane %v317_v27, 2 }
 0x280   : > { %v319_v29 = vmax.f32 %v317_v27, %v318_v28 }
 0x282   : > { %v320_v30 = vrot.slane %v319_v29, 1 }
 0x284   : > { %v321_v31 = vmax.f32 %v319_v29, %v320_v30 }
 0x286   : > { %v322_v32 = vsub.f32 %v311_v23, %v321_v31 }
 0x288   : > { %v323_v33 = vmul.f32 1.442695, %v322_v32 }
 0x28a   : > { %506 = vpow2.f32 %v323_v33 }
 0x294   : > { %v507_v34 = vpop.eup %506 }
 0x295   : > { %v325_v35 = vsel %vm312_vm3, %v507_v34, 0.0 }
 0x296   : > { %326 = vadd.xlane.f32.xlu0 %v325_v35 }
 0x323   : > { %v327_v36 = vpop.xlane.xlu0 %326 }
 0x324   : > { %v328_v37 = vrot.slane %v327_v36, 4 }
 0x326   : > { %v329_v38 = vadd.f32 %v328_v37, %v327_v36 }
 0x328   : > { %v330_v39 = vrot.slane %v329_v38, 2 }
 0x32a   : > { %v331_v40 = vadd.f32 %v330_v39, %v329_v38 }
 0x32c   : > { %v332_v41 = vrot.slane %v331_v40, 1 }
 0x32e   : > { %v333_v42 = vadd.f32 %v332_v41, %v331_v40 }
 0x330   : > { %508 = vrcp.f32 %v333_v42 }
 0x33a   : > { %v509_v43 = vpop.eup %508 }
 0x33b   : > { %v335_v44 = vmul.f32 %v509_v43, %v333_v42 }
 0x33d   : > { %v336_v45 = vsub.f32 2.0, %v335_v44 }
 0x33f   : > { %v337_v46 = vmul.f32 %v509_v43, %v336_v45 }
 0x341   : > { %v338_v47 = vmul.f32 %v337_v46, %v327_v36 }
 0x343   : > { %v339_v48 = vmul.f32 %v338_v47, %v258_v10 }
 0x345   : > { %341 = vst.msk [vmem:[%s174_s26] sm:$0xff] %vm340_vm4, %v339_v48 }
 0x346   : > { %523 = shalt.err (!%p520_p3)
}
 0x347   : > { %s524_s8 = scalar_lea.hbm %s673_s30, 128  ;;  %s528_s11 = scalar_lea.hbm %s718_s3, 256 }
 0x348   : > { %p525_p4 = scmp.ne.s32.totalorder %s673_s30, %s524_s8  ;;  %p529_p9 = scmp.lt.u32.totalorder %s673_s30, %s718_s3 }
 0x349   : > { %p530_p10 = scmp.lt.u32.totalorder %s528_s11, %s524_s8  ;;  %p532_p12 = scmp.lt.u32.totalorder %s524_s8, %s673_s30 }
 0x34a   : > { %p526_p7 = pnand %p525_p4, %p638_p5 }
 0x34b   : > { %p531_p11 = por %p530_p10, %p529_p9 }
 0x34c   : > { %p527_p8 = pneg %p526_p7 }
 0x34d   : > { %p533_p13 = por %p532_p12, %p531_p11 }
 0x34f   : > { %p534_p0 = pnand %p533_p13, %p527_p8 }
 0x351   : > { %537 = shalt.err (!%p534_p0)
}
 0x352   : > { %461 = dma.vmem_to_hbm [thread:$0]  (%p638_p5), %s675_s27, 128, %s673_s30, %s343_s4  }
 0x353 PF: > { %p467_p1 = scmp.ge.s32.totalorder %s572_s15, 2  ;;  %s368_s20 = sand.u32 1, %s560_s12  }
 0x354   : > { %s369_s24 = scalar_lea.sflag [#allocation3], %s368_s20 }
 0x355   : > { %p464_p2 = pnand %p467_p1, %p642_p6 }
 0x357   : > { %555 = dma.done.wait (!%p464_p2), %s369_s24, 128  }
 0x358   : > { %557 = vsyncadd (!%p464_p2), %s369_s24, 4294967168  ;;  %p13_p3 = scmp.ge.s32.totalorder %s625_s18, 4   ;;  %s721_s12 = smov %s564_s13 }
 0x359   : > { %s722_s13 = smov %s568_s14  ;;  %s723_s14 = smov %s636_s21 }
 0x35a   : > { %s724_s15 = smov %s625_s18  ;;  %15 = sbr.rel (!%p13_p3) target bundleno = 3 (0x3), region = 70 }
 0x361   :  { %374 = vsyncpa [#allocation3], 1 }
 0x362   :  { %376 = vsyncpa [#allocation3 + $0x1], 1 }

</bundles_post_ra>
